<compile_context>
chip_gen: v7x
topology: tpu7x:2x2x1
jax: 0.10.0
libtpu: 0.0.40
codegen_flags: <defaults>
</compile_context>

<pallas_src>
import functools

import jax
import jax.numpy as jnp
from jax.experimental import pallas as pl
from jax.experimental.pallas import tpu as pltpu

LIF_THRESHOLD = 0.2  # SN.LIFCell(n, 0.2, 0.01) -> threshold
LIF_DECAY = 0.01     # unused for a single step from zero membrane potential

_LANE = 128     # f32 lane width
_SUBLANE = 8    # f32 sublane count


def _round_up(n, m):
    return ((n + m - 1) // m) * m


def _pad2d(a, rows, cols):
    r, c = a.shape
    return jnp.pad(a, ((0, rows - r), (0, cols - c)))


def init_lsm_params(key, input_size, output_size, layer):
    """Deterministic parameter init mirroring the PyTorch __init__ shapes."""
    topology = [input_size] + list(layer)
    params = {"input_weights": [], "reservoir_weights": [], "reservoir_biases": []}
    for i in range(1, len(topology)):
        prev, cur = topology[i - 1], topology[i]
        key, k1, k2 = jax.random.split(key, 3)
        params["input_weights"].append(
            jax.random.normal(k1, (prev, cur), dtype=jnp.float32))
        params["reservoir_weights"].append(
            jax.random.normal(k2, (cur, cur), dtype=jnp.float32))
        params["reservoir_biases"].append(jnp.zeros((1, cur), dtype=jnp.float32))
    key, ko = jax.random.split(key)
    params["output_weight"] = jax.random.normal(
        ko, (topology[-1], output_size), dtype=jnp.float32)
    return params


def lsm_prepare(params, lane_multiple=_LANE):
    """One-time packing: pad to lane-aligned shapes, stack per-layer weights
    along a leading layer axis (streamed via the grid), and cast weights to
    bf16 (f32 accumulation happens in the kernel)."""
    in_size = params["input_weights"][0].shape[0]
    out_size = params["output_weight"].shape[1]

    # TODO(synk): on v6e/v7x, widths in (128, 256] benefit from
    # lane_multiple=256 (2x256^2 MXU); keep 128 on v5e.
    n_pad = max(_round_up(w.shape[1], lane_multiple)
                for w in params["input_weights"])
    s_pad = max(n_pad, _round_up(in_size, lane_multiple))  # state / K width

    w_in = jnp.stack([_pad2d(w, s_pad, n_pad) for w in params["input_weights"]])
    w_res = jnp.stack([_pad2d(w, n_pad, n_pad)
                       for w in params["reservoir_weights"]])
    b = jnp.stack([_pad2d(bb, 1, n_pad) for bb in params["reservoir_biases"]])
    w_out = _pad2d(params["output_weight"],
                   n_pad, _round_up(out_size, lane_multiple))

    return {
        "w_in": w_in.astype(jnp.bfloat16),      # (L, S, N)
        "w_res": w_res.astype(jnp.bfloat16),    # (L, N, N)
        "b": b.astype(jnp.float32),             # (L, 1, N)
        "w_out": w_out.astype(jnp.bfloat16),    # (N, out_p)
        "n_layers": len(params["input_weights"]),
        "in_size": in_size,
        "out_size": out_size,
        "s_pad": s_pad,
        "n_pad": n_pad,
    }


def _lsm_kernel(x_ref, w_in_ref, w_res_ref, b_ref, w_out_ref, out_ref,
                state_ref, *, in_size, n_pad):
    """One grid step = one liquid layer for one batch tile.

    grid = (batch_tiles, n_layers); the liquid state is resident in VMEM
    scratch across the layer axis, weights are streamed per layer.
    """
    l = pl.program_id(1)

    # Layer 0: (re)initialize the resident state from this batch tile's input.
    # Lanes beyond in_size are zeroed so the padded-K matmul is exact.
    @pl.when(l == 0)
    def _():
        state_ref[...] = jnp.zeros_like(state_ref)
        state_ref[:, 0:in_size] = x_ref[...].astype(jnp.float32)

    w_in = w_in_ref[0]    # (S, N) bf16
    w_res = w_res_ref[0]  # (N, N) bf16
    b = b_ref[0]          # (1, N) f32 -> broadcast over sublanes in-kernel

    # Weighted input (MXU, bf16 operands, f32 accumulation).
    wi = jnp.dot(state_ref[...].astype(jnp.bfloat16), w_in,
                 preferred_element_type=jnp.float32)
    # LIF spiking nonlinearity, single step from zero membrane potential (VPU).
    # Spikes are exactly 0/1, so the bf16 cast is lossless.
    spikes = (wi > LIF_THRESHOLD).astype(jnp.bfloat16)
    # Recurrent reservoir contribution (MXU).
    rec = jnp.dot(spikes, w_res, preferred_element_type=jnp.float32)
    # State update (VPU add + EUP tanh).
    new_state = jnp.tanh(wi + rec + b)
    # If S > N (input wider than any layer), lanes [N, S) stay zero / stale but
    # only ever multiply zero-padded weight rows, so this is exact.
    state_ref[:, 0:n_pad] = new_state

    # Final linear readout fused into the last layer step (lane-dense store).
    @pl.when(l == pl.num_programs(1) - 1)
    def _():
        out_ref[...] = jnp.dot(new_state.astype(jnp.bfloat16), w_out_ref[...],
                               preferred_element_type=jnp.float32
                               ).astype(out_ref.dtype)


def lsm_forward(packed, x):
    """Full LiquidStateMachine forward as one fused, layer-streamed Pallas call."""
    n_layers = packed["n_layers"]
    in_size = packed["in_size"]
    out_size = packed["out_size"]
    s_pad = packed["s_pad"]
    n_pad = packed["n_pad"]
    out_p = packed["w_out"].shape[1]

    batch = x.shape[0]
    assert x.shape[1] == in_size

    # Batch tiling: multiple of 8 sublanes; large batches tile at 256 rows and
    # the batch axis is "parallel" (second TensorCore on v7x; single tile and
    # harmless on v5e/v6e at small batch).
    batch_p = _round_up(batch, _SUBLANE)
    bt = min(256, batch_p)
    batch_p = _round_up(batch_p, bt)
    n_bt = batch_p // bt

    x_p = x.astype(jnp.float32)
    if batch_p != batch:
        # Only the batch (sublane) dim is padded; the feature dim stays at its
        # native width (no 128-wide K pad of the input in HBM).
        x_p = jnp.pad(x_p, ((0, batch_p - batch), (0, 0)))

    in_specs = [
        pl.BlockSpec((bt, in_size), lambda bi, li: (bi, 0)),         # x
        pl.BlockSpec((1, s_pad, n_pad), lambda bi, li: (li, 0, 0)),  # W_in (streamed)
        pl.BlockSpec((1, n_pad, n_pad), lambda bi, li: (li, 0, 0)),  # W_res (streamed)
        pl.BlockSpec((1, 1, n_pad), lambda bi, li: (li, 0, 0)),      # bias (streamed)
        pl.BlockSpec((n_pad, out_p), lambda bi, li: (0, 0)),         # W_out (resident)
    ]
    out_specs = pl.BlockSpec((bt, out_p), lambda bi, li: (bi, 0))

    # Advisory cost estimate for XLA's scheduler around the custom call.
    flops = (2 * batch_p * n_layers * (s_pad * n_pad + n_pad * n_pad)
             + 2 * batch_p * n_pad * out_p)
    bytes_accessed = (x_p.size * 4 + packed["w_in"].size * 2
                      + packed["w_res"].size * 2 + packed["b"].size * 4
                      + packed["w_out"].size * 2 + batch_p * out_p * 4)
    cost = pl.CostEstimate(flops=flops,
                           transcendentals=batch_p * n_layers * n_pad,
                           bytes_accessed=bytes_accessed)

    # Explicit VMEM budget: double-buffered streamed blocks + resident pieces
    # + slack.  Never below 16 MiB (v5e scoped default) so it is safe on all
    # generations, and it grows with the model instead of tripping the
    # 16/32 MiB scoped defaults (v5e / v6e+v7x).
    # TODO(synk): for very large reservoirs, also cap n_pad tiling so two
    # layers of bf16 weights fit v7x's 64 MiB physical VMEM.
    block_bytes = (bt * in_size * 4 + s_pad * n_pad * 2 + n_pad * n_pad * 2
                   + n_pad * 4 + bt * out_p * 4)
    resident_bytes = n_pad * out_p * 2 + bt * s_pad * 4
    vmem_limit = int(max(16 << 20,
                         min(2 * block_bytes + resident_bytes + (2 << 20),
                             64 << 20)))

    out_padded = pl.pallas_call(
        functools.partial(_lsm_kernel, in_size=in_size, n_pad=n_pad),
        out_shape=jax.ShapeDtypeStruct((batch_p, out_p), jnp.float32),
        grid_spec=pltpu.PrefetchScalarGridSpec(
            num_scalar_prefetch=0,
            grid=(n_bt, n_layers),
            in_specs=in_specs,
            out_specs=out_specs,
            scratch_shapes=[pltpu.VMEM((bt, s_pad), jnp.float32)],
        ),
        compiler_params=pltpu.CompilerParams(
            dimension_semantics=("parallel", "arbitrary"),
            vmem_limit_bytes=vmem_limit,
        ),
        cost_estimate=cost,
    )(x_p, packed["w_in"], packed["w_res"], packed["b"], packed["w_out"])

    return out_padded[:batch, :out_size]


def lsm_reference(params, x):
    """Pure-JAX reference mirroring the kernel numerics (bf16 operands,
    f32 accumulation; spikes are 0/1 so bf16 is lossless there)."""
    state = x.astype(jnp.float32)
    for i in range(len(params["input_weights"])):
        w_in = params["input_weights"][i].astype(jnp.bfloat16)
        w_res = params["reservoir_weights"][i].astype(jnp.bfloat16)
        wi = jnp.dot(state.astype(jnp.bfloat16), w_in,
                     preferred_element_type=jnp.float32)
        spikes = (wi > LIF_THRESHOLD).astype(jnp.bfloat16)
        rec = jnp.dot(spikes, w_res, preferred_element_type=jnp.float32)
        state = jnp.tanh(wi + rec + params["reservoir_biases"][i])
    return jnp.dot(state.astype(jnp.bfloat16),
                   params["output_weight"].astype(jnp.bfloat16),
                   preferred_element_type=jnp.float32)


if __name__ == "__main__":
    key = jax.random.PRNGKey(0)

    # Small shapes consistent with the module: input_size=16, layers=[32, 32],
    # output_size=8, batch=2.
    input_size = 16
    output_size = 8
    layer = [32, 32]
    batch = 2

    key, kp, kx = jax.random.split(key, 3)
    params = init_lsm_params(kp, input_size, output_size, layer)
    x = jax.random.normal(kx, (batch, input_size), dtype=jnp.float32)

    packed = lsm_prepare(params)
    out = lsm_forward(packed, x)
    out = jax.block_until_ready(out)

    ref = lsm_reference(params, x)
    assert out.shape == (batch, output_size), out.shape
    assert jnp.allclose(out, ref, atol=5e-3, rtol=5e-3), "mismatch vs reference"

    print("KERNEL_OK")
</pallas_src>

<mosaic_0001>
module attributes {stable_mosaic.version = 11 : i64} {
  func.func @_lsm_kernel(%arg0: i32, %arg1: i32, %arg2: memref<8x16xf32, #tpu.memory_space<vmem>>, %arg3: memref<1x128x128xbf16, #tpu.memory_space<vmem>>, %arg4: memref<1x128x128xbf16, #tpu.memory_space<vmem>>, %arg5: memref<1x1x128xf32, #tpu.memory_space<vmem>>, %arg6: memref<128x128xbf16, #tpu.memory_space<vmem>>, %arg7: memref<8x128xf32, #tpu.memory_space<vmem>>, %arg8: memref<8x128xf32, #tpu.memory_space<vmem>>) attributes {dimension_semantics = [#tpu.dimension_semantics<parallel>, #tpu.dimension_semantics<arbitrary>], iteration_bounds = array<i64: 1, 2>, scalar_prefetch = 0 : i64, scratch_operands = 1 : i64, tpu.core_type = #tpu.core_type<tc>, window_params = [{transform_indices = @transform_0, window_bounds = array<i64: 8, 16>}, {transform_indices = @transform_1, window_bounds = array<i64: 1, 128, 128>}, {transform_indices = @transform_2, window_bounds = array<i64: 1, 128, 128>}, {transform_indices = @transform_3, window_bounds = array<i64: 1, 1, 128>}, {pipeline_mode = #tpu.pipeline_mode<synchronous>, transform_indices = @transform_4, window_bounds = array<i64: 128, 128>}, {transform_indices = @transform_5, window_bounds = array<i64: 8, 128>}]} {
    %c0_i32 = arith.constant 0 : i32
    %0 = arith.cmpi eq, %arg1, %c0_i32 : i32
    %1 = arith.extui %0 : i1 to i32
    %c0_i32_0 = arith.constant 0 : i32
    %2 = arith.cmpi ne, %1, %c0_i32_0 : i32
    scf.if %2 {
      %cst_16 = arith.constant 0.000000e+00 : f32
      %26 = vector.broadcast %cst_16 : f32 to vector<8x128xf32>
      %c0_17 = arith.constant 0 : index
      %c0_18 = arith.constant 0 : index
      %27 = vector.load %arg8[%c0_17, %c0_18] : memref<8x128xf32, #tpu.memory_space<vmem>>, vector<8x128xf32>
      tpu.vector_store %arg8[%c0_17, %c0_18], %26 {strides = array<i32>} : memref<8x128xf32, #tpu.memory_space<vmem>>, vector<8x128xf32>,
      %c0_19 = arith.constant 0 : index
      %c0_20 = arith.constant 0 : index
      %28 = vector.load %arg2[%c0_19, %c0_20] : memref<8x16xf32, #tpu.memory_space<vmem>>, vector<8x16xf32>
      %c0_21 = arith.constant 0 : index
      %c0_22 = arith.constant 0 : index
      %29 = vector.load %arg8[%c0_21, %c0_22] : memref<8x128xf32, #tpu.memory_space<vmem>>, vector<8x16xf32>
      tpu.vector_store %arg8[%c0_21, %c0_22], %28 {strides = array<i32>} : memref<8x128xf32, #tpu.memory_space<vmem>>, vector<8x16xf32>,
    } else {
    }
    %c0 = arith.constant 0 : index
    %c0_1 = arith.constant 0 : index
    %c0_2 = arith.constant 0 : index
    %3 = vector.load %arg3[%c0, %c0_1, %c0_2] : memref<1x128x128xbf16, #tpu.memory_space<vmem>>, vector<1x128x128xbf16>
    %4 = vector.shape_cast %3 : vector<1x128x128xbf16> to vector<128x128xbf16>
    %c0_3 = arith.constant 0 : index
    %c0_4 = arith.constant 0 : index
    %c0_5 = arith.constant 0 : index
    %5 = vector.load %arg4[%c0_3, %c0_4, %c0_5] : memref<1x128x128xbf16, #tpu.memory_space<vmem>>, vector<1x128x128xbf16>
    %6 = vector.shape_cast %5 : vector<1x128x128xbf16> to vector<128x128xbf16>
    %c0_6 = arith.constant 0 : index
    %c0_7 = arith.constant 0 : index
    %c0_8 = arith.constant 0 : index
    %7 = vector.load %arg5[%c0_6, %c0_7, %c0_8] : memref<1x1x128xf32, #tpu.memory_space<vmem>>, vector<1x1x128xf32>
    %8 = vector.shape_cast %7 : vector<1x1x128xf32> to vector<1x128xf32>
    %c0_9 = arith.constant 0 : index
    %c0_10 = arith.constant 0 : index
    %9 = vector.load %arg8[%c0_9, %c0_10] : memref<8x128xf32, #tpu.memory_space<vmem>>, vector<8x128xf32>
    %10 = arith.truncf %9 : vector<8x128xf32> to vector<8x128xbf16>
    %cst = arith.constant dense<0.000000e+00> : vector<8x128xf32>
    %11 = tpu.matmul %10, %4, %cst {dimension_numbers = #tpu.dot_dimension_numbers<[1], [0], [0], [1], [0, 0, 1, 1], [], []>} : vector<8x128xbf16>, vector<128x128xbf16>, vector<8x128xf32> -> vector<8x128xf32>
    %cst_11 = arith.constant 2.000000e-01 : f32
    %12 = vector.broadcast %cst_11 : f32 to vector<8x128xf32>
    %13 = arith.cmpf ogt, %11, %12 : vector<8x128xf32>
    %14 = arith.extui %13 : vector<8x128xi1> to vector<8x128xi32>
    %15 = arith.sitofp %14 : vector<8x128xi32> to vector<8x128xf32>
    %16 = arith.truncf %15 : vector<8x128xf32> to vector<8x128xbf16>
    %cst_12 = arith.constant dense<0.000000e+00> : vector<8x128xf32>
    %17 = tpu.matmul %16, %6, %cst_12 {dimension_numbers = #tpu.dot_dimension_numbers<[1], [0], [0], [1], [0, 0, 1, 1], [], []>} : vector<8x128xbf16>, vector<128x128xbf16>, vector<8x128xf32> -> vector<8x128xf32>
    %18 = arith.addf %11, %17 : vector<8x128xf32>
    %19 = vector.broadcast %8 : vector<1x128xf32> to vector<8x128xf32>
    %20 = arith.addf %18, %19 : vector<8x128xf32>
    %21 = math.tanh %20 : vector<8x128xf32>
    %c0_13 = arith.constant 0 : index
    %c0_14 = arith.constant 0 : index
    %22 = vector.load %arg8[%c0_13, %c0_14] : memref<8x128xf32, #tpu.memory_space<vmem>>, vector<8x128xf32>
    tpu.vector_store %arg8[%c0_13, %c0_14], %21 {strides = array<i32>} : memref<8x128xf32, #tpu.memory_space<vmem>>, vector<8x128xf32>,
    %c1_i32 = arith.constant 1 : i32
    %23 = arith.cmpi eq, %arg1, %c1_i32 : i32
    %24 = arith.extui %23 : i1 to i32
    %c0_i32_15 = arith.constant 0 : i32
    %25 = arith.cmpi ne, %24, %c0_i32_15 : i32
    scf.if %25 {
      %26 = arith.truncf %21 : vector<8x128xf32> to vector<8x128xbf16>
      %c0_16 = arith.constant 0 : index
      %c0_17 = arith.constant 0 : index
      %27 = vector.load %arg6[%c0_16, %c0_17] : memref<128x128xbf16, #tpu.memory_space<vmem>>, vector<128x128xbf16>
      %cst_18 = arith.constant dense<0.000000e+00> : vector<8x128xf32>
      %28 = tpu.matmul %26, %27, %cst_18 {dimension_numbers = #tpu.dot_dimension_numbers<[1], [0], [0], [1], [0, 0, 1, 1], [], []>} : vector<8x128xbf16>, vector<128x128xbf16>, vector<8x128xf32> -> vector<8x128xf32>
      %c0_19 = arith.constant 0 : index
      %c0_20 = arith.constant 0 : index
      %29 = vector.load %arg7[%c0_19, %c0_20] : memref<8x128xf32, #tpu.memory_space<vmem>>, vector<8x128xf32>
      tpu.vector_store %arg7[%c0_19, %c0_20], %28 {strides = array<i32>} : memref<8x128xf32, #tpu.memory_space<vmem>>, vector<8x128xf32>,
    } else {
    }
    return
  }
  func.func @transform_0(%arg0: i32, %arg1: i32) -> (i32, i32) {
    %c0_i32 = arith.constant 0 : i32
    %c0_i32_0 = arith.constant 0 : i32
    return %arg0, %c0_i32 : i32, i32
  }
  func.func @transform_1(%arg0: i32, %arg1: i32) -> (i32, i32, i32) {
    %c0_i32 = arith.constant 0 : i32
    %c0_i32_0 = arith.constant 0 : i32
    %c0_i32_1 = arith.constant 0 : i32
    return %arg1, %c0_i32, %c0_i32_0 : i32, i32, i32
  }
  func.func @transform_2(%arg0: i32, %arg1: i32) -> (i32, i32, i32) {
    %c0_i32 = arith.constant 0 : i32
    %c0_i32_0 = arith.constant 0 : i32
    %c0_i32_1 = arith.constant 0 : i32
    return %arg1, %c0_i32, %c0_i32_0 : i32, i32, i32
  }
  func.func @transform_3(%arg0: i32, %arg1: i32) -> (i32, i32, i32) {
    %c0_i32 = arith.constant 0 : i32
    %c0_i32_0 = arith.constant 0 : i32
    %c0_i32_1 = arith.constant 0 : i32
    return %arg1, %c0_i32, %c0_i32_0 : i32, i32, i32
  }
  func.func @transform_4(%arg0: i32, %arg1: i32) -> (i32, i32) {
    %c0_i32 = arith.constant 0 : i32
    %c0_i32_0 = arith.constant 0 : i32
    %c0_i32_1 = arith.constant 0 : i32
    return %c0_i32, %c0_i32_0 : i32, i32
  }
  func.func @transform_5(%arg0: i32, %arg1: i32) -> (i32, i32) {
    %c0_i32 = arith.constant 0 : i32
    %c0_i32_0 = arith.constant 0 : i32
    return %arg0, %c0_i32 : i32, i32
  }
}

</mosaic_0001>

<bundles_post_ra>
// kernel: tpu_custom_call.1
= control target key start
LH: loop header
LB: loop body
LE: loop exit
PB: predicated region body
PF: predicated region fallthrough
CT: control target
= control target key end

     0   :  { %10 = vsyncpa [#allocation4], 0  ;;  %s1620_s0 = inlined_call_operand.hbm [shape: f32[8,16], index: 0, kind: input, shape index: {}]   ;;  %s1621_s1 = inlined_call_operand.hbm [shape: bf16[2,128,128], index: 1, kind: input, shape index: {}]   ;;  %s1622_s2 = inlined_call_operand.hbm [shape: bf16[2,128,128], index: 2, kind: input, shape index: {}]   ;;  %s1623_s3 = inlined_call_operand.vmem [shape: f32[2,1,128], index: 3, kind: input, shape index: {}]   ;;  %s1624_s4 = inlined_call_operand.hbm [shape: bf16[128,128], index: 4, kind: input, shape index: {}]   ;;  %s1625_s5 = inlined_call_operand.hbm [shape: f32[8,128], index: 5, kind: output, shape index: {}]  }
   0x1   :  { %11 = vsyncpa [#allocation7], 0 }
   0x2   :  { %13 = vsyncpa [#allocation7 + $0x1], 0 }
   0x3   :  { %14 = vsyncpa [#allocation10], 0 }
   0x4   :  { %15 = vsyncpa [#allocation5], 0  ;;  %s1311_s18 = smov 0   ;;  %s1313_s19 = smov 0  }
   0x5   :  { %s1315_s20 = smov 0   ;;  %s1317_s21 = smov 0  }
   0x6   :  { %s1319_s22 = smov 0   ;;  %s1321_s23 = smov 0  }
   0x7 LB: > { %s30_s24 = sadd.s32 1, %s1262_s22  ;;  %s66_s25 = sadd.s32 1, %s1254_s20  ;;  %s1266_s23 = sphi %s1321_s23, %s21_s23   ;;  %s1262_s22 = sphi %s1319_s22, %s1647_s22   ;;  %s1258_s21 = sphi %s1317_s21, %s1646_s21   ;;  %s1254_s20 = sphi %s1315_s20, %s1645_s20   ;;  %s1250_s19 = sphi %s1313_s19, %s1644_s19   ;;  %s1246_s18 = sphi %s1311_s18, %s1643_s18  }
   0x8   : > { %p31_p0 = scmp.ge.s32.totalorder %s30_s24, 2  ;;  %p73_p1 = scmp.ne.s32.totalorder %s1254_s20, %s1250_s19 }
   0x9   : > { %p74_p2 = scmp.eq.s32.totalorder %s1266_s23, 0  ;;  %p972_p5 = scmp.lt.s32.totalorder %s1266_s23, 2 }
   0xa   : > { %s1649_s24 = smov (%p31_p0, %s30_s24), 0  ;;  %s228_s28 = sand.u32 1, %s1266_s23  }
   0xb   : > { %p1348_p3 = por %p74_p2, %p73_p1  ;;  %s63_s27 = ssub.s32 %s1262_s22, %s1649_s24 }
   0xc   : > { %p64_p4 = scmp.eq.s32.totalorder %s63_s27, 0  ;;  %s230_s29 = sand.u32 1, %s1254_s20  }
   0xd   : > { %s1360_s6 = sshll.u32 %s230_s29, 6  ;;  %s851_s7 = sshll.u32 %s1262_s22, 10 }
   0xe   : > { %s1358_s30 = scalar_select %p64_p4, %s1254_s20, %s66_s25  }
   0xf   : > { %s1366_s10 = scalar_lea.hbm %s1621_s1, %s851_s7  ;;  %s232_s11 = scalar_lea.vmem [#allocation6], %s1360_s6 }
  0x10   : > { %s239_s12 = sshll.u32 %s232_s11, 4  ;;  %p1373_p6 = pnand %p972_p5, %p1348_p3  ;;  %s1369_s12 = int_to_ptr.vmem [resolvable:$true] %s239_s12 }
  0x11   : > { %s1380_s16 = scalar_lea.hbm %s1622_s2, %s851_s7  ;;  %s1382_s17 = scalar_lea.sflag [#allocation7], %s228_s28 }
  0x12   : > { %s1062_s25 = scalar_lea.hbm %s1366_s10, 1024  ;;  %p1064_p8 = pneg %p1373_p6 }
  0x13   : > { %p1063_p7 = scmp.ne.s32.totalorder %s1366_s10, %s1062_s25  ;;  %s1067_s29 = scalar_lea.hbm %s1621_s1, 2048 }
  0x14   : > { %p1068_p11 = scmp.lt.u32.totalorder %s1366_s10, %s1621_s1  ;;  %p1069_p12 = scmp.lt.u32.totalorder %s1067_s29, %s1062_s25 }
  0x15   : > { %p1065_p9 = pnand %p1064_p8, %p1063_p7  ;;  %p1071_p0 = scmp.lt.u32.totalorder %s1062_s25, %s1366_s10 }
  0x16   : > { %p1070_p13 = por %p1069_p12, %p1068_p11 }
  0x17   : > { %p1066_p10 = pneg %p1065_p9 }
  0x18   : > { %p1072_p1 = por %p1071_p0, %p1070_p13 }
  0x1a   : > { %p1073_p2 = pnand %p1072_p1, %p1066_p10 }
  0x1c   : > { %1076 = shalt.err (!%p1073_p2)
}
  0x1d   : > { %s1077_s28 = scalar_lea.vmem %s1369_s12, 1024  ;;  %s1268_s7 = smov [#allocation6]  }
  0x1e   : > { %p1078_p3 = scmp.ne.s32.totalorder %s1369_s12, %s1077_s28  ;;  %s1082_s11 = sshll.u32 %s1268_s7, 4  ;;  %s1083_s11 = int_to_ptr.vmem [resolvable:$false] %s1082_s11 }
  0x1f   : > { %s1084_s14 = scalar_lea.vmem %s1083_s11, 2048  ;;  %p1085_p7 = scmp.lt.s32.totalorder %s1369_s12, %s1083_s11 }
  0x20   : > { %p1080_p4 = pnand %p1078_p3, %p1064_p8  ;;  %p1086_p9 = scmp.lt.s32.totalorder %s1084_s14, %s1077_s28 }
  0x22   : > { %p1081_p5 = pneg %p1080_p4  ;;  %p1087_p11 = por %p1086_p9, %p1085_p7 }
  0x24   : > { %p1088_p12 = pnand %p1087_p11, %p1081_p5 }
  0x26   : > { %1091 = shalt.err (!%p1088_p12)
}
  0x27   : > { %s1626_s15 = smov 64   ;;  %s1270_s25 = smov 4  }
  0x28   : > { %966 = dma.hbm_to_vmem [thread:$0]  (!%p1373_p6), %s1366_s10, 1024, %s1369_s12, %s1382_s17, %s1626_s15, %s1626_s15, %s1270_s25  }
  0x29   : > { %s253_s26 = scalar_lea.vmem [#allocation8], %s1360_s6  ;;  %s1415_s29 = sadd.s32 4294967295, %s1266_s23  }
  0x2a   : > { %s260_s27 = sshll.u32 %s253_s26, 4  ;;  %p79_p10 = scmp.ne.s32.totalorder %s1250_s19, %s1246_s18  ;;  %s1432_s27 = int_to_ptr.vmem [resolvable:$true] %s260_s27 }
  0x2b   : > { %p1628_p13 = scmp.eq.s32.totalorder %s1415_s29, 0  ;;  %p802_p0 = scmp.ge.s32.totalorder %s1266_s23, 1 }
  0x2c   : > { %p189_p1 = scmp.lt.s32.totalorder %s1266_s23, 3  ;;  %s1271_s10 = smov [#allocation3]  }
  0x2d   : > { %p1424_p2 = por %p1628_p13, %p79_p10  ;;  %s204_s12 = sshll.u32 %s1271_s10, 4  ;;  %s1436_s12 = int_to_ptr.vmem [resolvable:$true] %s204_s12 }
  0x2e   : > { %p1428_p3 = pnand %p802_p0, %p189_p1  ;;  %s1272_s18 = smov [#allocation9]  }
  0x2f   : > { %s1633_s8 = scalar_select %p1424_p2, 1, 0 }
  0x30   : > { %s1634_s6 = scalar_select %p1428_p3, 1, 0 }
  0x31   : > { %p956_p4 = pneg %p1428_p3  ;;  %s214_s9 = sshll.u32 %s1272_s18, 4  ;;  %s1444_s9 = int_to_ptr.vmem [resolvable:$true] %s214_s9 }
  0x32   : > { %s1092_s7 = scalar_lea.hbm %s1380_s16, 1024  ;;  %s1097_s26 = scalar_lea.hbm %s1622_s2, 2048 }
  0x33   : > { %p1440_p5 = pnand %p956_p4, %p1628_p13  ;;  %p1093_p7 = scmp.ne.s32.totalorder %s1380_s16, %s1092_s7 }
  0x34   : > { %p1098_p12 = scmp.lt.u32.totalorder %s1380_s16, %s1622_s2  ;;  %p1099_p10 = scmp.lt.u32.totalorder %s1097_s26, %s1092_s7 }
  0x35   : > { %p1095_p9 = pnand %p1093_p7, %p1064_p8  ;;  %p1101_p1 = scmp.lt.u32.totalorder %s1092_s7, %s1380_s16 }
  0x36   : > { %p1100_p0 = por %p1099_p10, %p1098_p12 }
  0x37   : > { %p1096_p11 = pneg %p1095_p9 }
  0x38   : > { %p1102_p4 = por %p1101_p1, %p1100_p0 }
  0x3a   : > { %p1103_p13 = pnand %p1102_p4, %p1096_p11 }
  0x3c   : > { %1106 = shalt.err (!%p1103_p13)
}
  0x3d   : > { %s1107_s18 = scalar_lea.vmem %s1432_s27, 1024  ;;  %s1273_s11 = smov [#allocation8]  }
  0x3e   : > { %p1108_p7 = scmp.ne.s32.totalorder %s1432_s27, %s1107_s18  ;;  %s1112_s14 = sshll.u32 %s1273_s11, 4  ;;  %s1113_s14 = int_to_ptr.vmem [resolvable:$false] %s1112_s14 }
  0x3f   : > { %s1114_s15 = scalar_lea.vmem %s1113_s14, 2048  ;;  %p1115_p3 = scmp.lt.s32.totalorder %s1432_s27, %s1113_s14 }
  0x40   : > { %p1110_p9 = pnand %p1108_p7, %p1064_p8  ;;  %p1116_p12 = scmp.lt.s32.totalorder %s1114_s15, %s1107_s18 }
  0x42   : > { %p1111_p2 = pneg %p1110_p9  ;;  %p1117_p10 = por %p1116_p12, %p1115_p3 }
  0x44   : > { %p1118_p0 = pnand %p1117_p10, %p1111_p2 }
  0x46   : > { %1121 = shalt.err (!%p1118_p0)
}
  0x47   : > { %s1636_s7 = smov 64   ;;  %s1122_s11 = scalar_lea.hbm %s1620_s0, 128 }
  0x48   : > { %969 = dma.hbm_to_vmem [thread:$0]  (!%p1373_p6), %s1380_s16, 1024, %s1432_s27, %s1382_s17, %s1636_s7, %s1636_s7, %s1270_s25  }
  0x49   : > { %p1123_p8 = scmp.ne.s32.totalorder %s1620_s0, %s1122_s11  ;;  %p1124_p13 = pneg %p1440_p5 }
  0x4a   : > { %p1129_p11 = scmp.lt.u32.totalorder %s1122_s11, %s1620_s0 }
  0x4b   : > { %p1125_p2 = pnand %p1124_p13, %p1123_p8 }
  0x4d   : > { %p1126_p3 = pneg %p1125_p2 }
  0x4f   : > { %p1131_p1 = pnand %p1129_p11, %p1126_p3 }
  0x51   : > { %1134 = shalt.err (!%p1131_p1)
}
  0x52   : > { %s1135_s16 = scalar_lea.vmem %s1436_s12, 128  ;;  %p1143_p9 = scmp.lt.s32.totalorder %s1436_s12, %s1436_s12 }
  0x53   : > { %p1136_p6 = scmp.ne.s32.totalorder %s1436_s12, %s1135_s16  ;;  %p1144_p12 = scmp.lt.s32.totalorder %s1135_s16, %s1135_s16 }
  0x55   : > { %p1138_p4 = pnand %p1136_p6, %p1124_p13  ;;  %p1145_p10 = por %p1144_p12, %p1143_p9 }
  0x57   : > { %p1139_p7 = pneg %p1138_p4 }
  0x59   : > { %p1146_p0 = pnand %p1145_p10, %p1139_p7 }
  0x5b   : > { %1149 = shalt.err (!%p1146_p0)
}
  0x5c   : > { %959 = dma.hbm_to_vmem [thread:$0]  (!%p1440_p5), %s1620_s0, 128, %s1436_s12, [#allocation4]  }
  0x5d   : > { %s1150_s11 = scalar_lea.hbm %s1624_s4, 1024 }
  0x5e   : > { %p1151_p8 = scmp.ne.s32.totalorder %s1624_s4, %s1150_s11  ;;  %p1157_p11 = scmp.lt.u32.totalorder %s1150_s11, %s1624_s4 }
  0x60   : > { %p1153_p2 = pnand %p1151_p8, %p1124_p13 }
  0x62   : > { %p1154_p3 = pneg %p1153_p2 }
  0x64   : > { %p1159_p1 = pnand %p1157_p11, %p1154_p3 }
  0x66   : > { %1162 = shalt.err (!%p1159_p1)
}
  0x67   : > { %s1163_s12 = scalar_lea.vmem %s1444_s9, 1024  ;;  %p1171_p9 = scmp.lt.s32.totalorder %s1444_s9, %s1444_s9 }
  0x68   : > { %p1164_p6 = scmp.ne.s32.totalorder %s1444_s9, %s1163_s12  ;;  %p1172_p12 = scmp.lt.s32.totalorder %s1163_s12, %s1163_s12 }
  0x6a   : > { %p1166_p4 = pnand %p1164_p6, %p1124_p13  ;;  %p1173_p10 = por %p1172_p12, %p1171_p9 }
  0x6c   : > { %p1167_p7 = pneg %p1166_p4 }
  0x6e   : > { %p1174_p0 = pnand %p1173_p10, %p1167_p7 }
  0x70   : > { %1177 = shalt.err (!%p1174_p0)
}
  0x71   : > { %962 = dma.hbm_to_vmem [thread:$0]  (!%p1440_p5), %s1624_s4, 1024, %s1444_s9, [#allocation10], %s1636_s7, %s1636_s7, %s1270_s25  }
  0x72   : > { %p1637_p8 = scmp.ne.s32.totalorder %s1634_s6, 0 }
  0x73   : > { %p1638_p13 = scmp.eq.s32.totalorder (!%p1637_p8), %s1415_s29, 0 }
  0x74   : > { %278 = sbr.rel (%p1637_p8) target bundleno = 858 (0x35a), region = 40 }
  0x7b   : > { %1229 = dma.done.wait (%p1638_p13), [#allocation4], 128   ;;  %p1639_p2 = pmov %p1638_p13 }
  0x7c   : > { %s284_s28 = sand.u32 1, %s1415_s29   ;;  %s286_s27 = sand.u32 1, %s1250_s19  }
  0x7d   : > { %1231 = vsyncadd (%p1639_p2), [#allocation4], 4294967168  ;;  %s814_s26 = sshll.u32 %s286_s27, 6  ;;  %s285_s10 = scalar_lea.sflag [#allocation7], %s284_s28 }
  0x7e   : > { %s1536_s11 = scalar_lea.vmem [#allocation6], %s814_s26  ;;  %p1640_p3 = scmp.ne.s32.totalorder %s1633_s8, 0 }
  0x80   : > { %1233 = dma.done.wait (%p1640_p3), %s285_s10, 2048  }
  0x81   : > { %1235 = vsyncadd (%p1640_p3), %s285_s10, 4294965248  ;;  %s1542_s25 = scalar_lea.vmem [#allocation8], %s814_s26  ;;  %p1641_p5 = pmov %p1639_p2 }
  0x82   : > { %p1642_p11 = pmov %p1639_p2 }
  0x83   : > { %1237 = dma.done.wait (%p1641_p5), [#allocation10], 1024  }
  0x84   : > { %1239 = vsyncadd (%p1642_p11), [#allocation10], 4294966272  ;;  %p331_p1 = scmp.lt.s32.totalorder %s1258_s21, 1  ;;  %p817_p6 = scmp.ne.s32.totalorder %s1258_s21, 0 }
  0x85   : > { %v340_v0 = vld [vmem:[#allocation3] sm:$0xff] (!%p817_p6)  ;;  %vm341_vm0 = vcmask (!%p817_p6), 130048   ;;  %v1274_v1 = vmov (!%p817_p6), 0.0  }
  0x86   : > { %s1550_s6 = scalar_select %p331_p1, %s1258_s21, 1 }
  0x87   : > { %338 = sbr.rel (%p817_p6) target bundleno = 142 (0x8e), region = 60  ;;  %339 = vst [vmem:[#allocation2] sm:$0xff] (!%p817_p6), %v1274_v1 }
  0x88   : > { %s333_s14 = scalar_lea.vmem %s1623_s3, %s1550_s6  ;;  %342 = vst.msk [vmem:[#allocation2] sm:$0xff] (!%p817_p6), %vm341_vm0, %v340_v0 }
  0x8e PF: > { %v1036_v2 = vld [vmem:[%s1536_s11] sm:$0xff]   ;;  %v1275_v3 = vmov 0.0   ;;  %v1037_v4 = vld [vmem:[%s1536_s11 + $0x8] sm:$0xff]   ;;  %vm1276_vm1 = vmmov 0   ;;  %v1038_v5 = vld [vmem:[%s1536_s11 + $0x10] sm:$0xff]   ;;  %p838_p4 = scmp.ne.s32.totalorder %s1258_s21, 1 }
  0x8f   : > { %880 = vmatprep.subr.bf16.mxu0 %v1275_v3  ;;  %900 = vmatprep.subr.bf16.mxu1 %v1275_v3  ;;  %v1044_v6 = vld [vmem:[%s1542_s25] sm:$0xff]   ;;  %v1039_v7 = vld [vmem:[%s1536_s11 + $0x18] sm:$0xff]   ;;  %v1045_v8 = vld [vmem:[%s1542_s25 + $0x8] sm:$0xff]   ;;  %v1277_v25 = vmov 1.0|1.0   ;;  %v1278_v35 = vmov (!%p838_p4), 0.0  }
  0x90   : > { %881 = vmatpush3.bf16.msra.mxu0 %v1036_v2  ;;  %896 = vmatprep.mubr.msk.bf16.mxu0 %vm1276_vm1, %v1275_v3  ;;  %v1040_v9 = vld [vmem:[%s1536_s11 + $0x20] sm:$0xff]   ;;  %v1046_v10 = vld [vmem:[%s1542_s25 + $0x10] sm:$0xff]   ;;  %v1041_v11 = vld [vmem:[%s1536_s11 + $0x28] sm:$0xff]   ;;  %vm1279_vm4 = vmmov (!%p838_p4), 0  }
  0x91   : > { %882 = vmatprep.subr.bf16.mxu0 %v1275_v3  ;;  %916 = vmatprep.mubr.msk.bf16.mxu1 %vm1276_vm1, %v1275_v3  ;;  %v1047_v12 = vld [vmem:[%s1542_s25 + $0x18] sm:$0xff]   ;;  %v1042_v13 = vld [vmem:[%s1536_s11 + $0x30] sm:$0xff]   ;;  %v1048_v14 = vld [vmem:[%s1542_s25 + $0x20] sm:$0xff]  }
  0x92   : > { %901 = vmatpush3.bf16.msra.mxu1 %v1044_v6  ;;  %v1043_v15 = vld [vmem:[%s1536_s11 + $0x38] sm:$0xff]   ;;  %v376_v16 = vld [vmem:[#allocation2] sm:$0xff]  ;;  %v1049_v17 = vld [vmem:[%s1542_s25 + $0x28] sm:$0xff]  }
  0x93   : > { %902 = vmatprep.subr.bf16.mxu1 %v1275_v3  ;;  %v377_v18 = vpack.c.bf16 %v376_v16, %v376_v16  ;;  %v1050_v19 = vld [vmem:[%s1542_s25 + $0x30] sm:$0xff]   ;;  %v1051_v20 = vld [vmem:[%s1542_s25 + $0x38] sm:$0xff]   ;;  %v1054_v34 = vld [vmem:[#allocation9] sm:$0xff] (!%p838_p4)  }
  0x94   : > { %883 = vmatpush3.bf16.msra.mxu0 %v1037_v4  ;;  %v837_v26 = vld [vmem:[%s333_s14] ss:$0 sm:$0xff]  ;;  %v1055_v36 = vld [vmem:[#allocation9 + $0x8] sm:$0xff] (!%p838_p4)   ;;  %v1057_v38 = vld [vmem:[#allocation9 + $0x18] sm:$0xff] (!%p838_p4)  }
  0x95   : > { %884 = vmatprep.subr.bf16.mxu0 %v1275_v3  ;;  %v1056_v37 = vld [vmem:[#allocation9 + $0x10] sm:$0xff] (!%p838_p4)   ;;  %v1058_v39 = vld [vmem:[#allocation9 + $0x20] sm:$0xff] (!%p838_p4)   ;;  %v1059_v40 = vld [vmem:[#allocation9 + $0x28] sm:$0xff] (!%p838_p4)  }
  0x96   : > { %903 = vmatpush3.bf16.msra.mxu1 %v1045_v8  ;;  %v1060_v41 = vld [vmem:[#allocation9 + $0x30] sm:$0xff] (!%p838_p4)   ;;  %v1061_v42 = vld [vmem:[#allocation9 + $0x38] sm:$0xff] (!%p838_p4)  }
  0x97   : > { %904 = vmatprep.subr.bf16.mxu1 %v1275_v3 }
  0x98   : > { %885 = vmatpush3.bf16.msra.mxu0 %v1038_v5 }
  0x99   : > { %886 = vmatprep.subr.bf16.mxu0 %v1275_v3 }
  0x9a   : > { %905 = vmatpush3.bf16.msra.mxu1 %v1046_v10 }
  0x9b   : > { %906 = vmatprep.subr.bf16.mxu1 %v1275_v3 }
  0x9c   : > { %887 = vmatpush3.bf16.msra.mxu0 %v1039_v7 }
  0x9d   : > { %888 = vmatprep.subr.bf16.mxu0 %v1275_v3 }
  0x9e   : > { %907 = vmatpush3.bf16.msra.mxu1 %v1047_v12 }
  0x9f   : > { %908 = vmatprep.subr.bf16.mxu1 %v1275_v3 }
  0xa0   : > { %889 = vmatpush3.bf16.msra.mxu0 %v1040_v9 }
  0xa1   : > { %890 = vmatprep.subr.bf16.mxu0 %v1275_v3 }
  0xa2   : > { %909 = vmatpush3.bf16.msra.mxu1 %v1048_v14 }
  0xa3   : > { %910 = vmatprep.subr.bf16.mxu1 %v1275_v3 }
  0xa4   : > { %891 = vmatpush3.bf16.msra.mxu0 %v1041_v11 }
  0xa5   : > { %892 = vmatprep.subr.bf16.mxu0 %v1275_v3 }
  0xa6   : > { %911 = vmatpush3.bf16.msra.mxu1 %v1049_v17 }
  0xa7   : > { %912 = vmatprep.subr.bf16.mxu1 %v1275_v3 }
  0xa8   : > { %893 = vmatpush3.bf16.msra.mxu0 %v1042_v13 }
  0xa9   : > { %894 = vmatprep.subr.bf16.mxu0 %v1275_v3 }
  0xaa   : > { %913 = vmatpush3.bf16.msra.mxu1 %v1050_v19 }
  0xab   : > { %914 = vmatprep.subr.bf16.mxu1 %v1275_v3 }
  0xac   : > { %895 = vmatpush3.bf16.msra.mxu0 %v1043_v15 }
  0xad   : > { %920 = vmatprep.subr.bf16.mxu0 (!%p838_p4), %v1278_v35 }
  0xae   : > { %915 = vmatpush3.bf16.msra.mxu1 %v1051_v20 }
  0xaf   : > { %897 = vmatmul.mubr.bf16.vlgmr.msra.gmra.mrb[0].mxu0 %v377_v18 }
  0xb0   : > { %921 = vmatpush3.bf16.msra.mxu0 (!%p838_p4), %v1054_v34  ;;  %936 = vmatprep.mubr.msk.bf16.mxu0 (!%p838_p4), %vm1279_vm4, %v1278_v35 }
  0xb1   : > { %922 = vmatprep.subr.bf16.mxu0 (!%p838_p4), %v1278_v35 }
  0xb4   : > { %923 = vmatpush3.bf16.msra.mxu0 (!%p838_p4), %v1055_v36 }
  0xb5   : > { %924 = vmatprep.subr.bf16.mxu0 (!%p838_p4), %v1278_v35 }
  0xb8   : > { %925 = vmatpush3.bf16.msra.mxu0 (!%p838_p4), %v1056_v37 }
  0xb9   : > { %926 = vmatprep.subr.bf16.mxu0 (!%p838_p4), %v1278_v35 }
  0xbc   : > { %927 = vmatpush3.bf16.msra.mxu0 (!%p838_p4), %v1057_v38 }
  0xbd   : > { %928 = vmatprep.subr.bf16.mxu0 (!%p838_p4), %v1278_v35 }
  0xc0   : > { %929 = vmatpush3.bf16.msra.mxu0 (!%p838_p4), %v1058_v39 }
  0xc1   : > { %930 = vmatprep.subr.bf16.mxu0 (!%p838_p4), %v1278_v35 }
  0xc4   : > { %931 = vmatpush3.bf16.msra.mxu0 (!%p838_p4), %v1059_v40 }
  0xc5   : > { %932 = vmatprep.subr.bf16.mxu0 (!%p838_p4), %v1278_v35 }
  0xc8   : > { %933 = vmatpush3.bf16.msra.mxu0 (!%p838_p4), %v1060_v41 }
  0xc9   : > { %934 = vmatprep.subr.bf16.mxu0 (!%p838_p4), %v1278_v35 }
  0xcc   : > { %935 = vmatpush3.bf16.msra.mxu0 (!%p838_p4), %v1061_v42 }
 0x182   : > { %v460_v21 = vpop.f32.mrb[0].mxu0 }
 0x183   : > { %vm466_vm2 = vcmp.gt.f32.partialorder %v460_v21, 0.2  ;;  %v898_v22 = vpop.f32.mrb[1].mxu0 }
 0x184   : > { %vm835_vm3 = vmpackc.low %vm466_vm2, %vm466_vm2  ;;  %v463_v23 = vpop.f32.mrb[2].mxu0 }
 0x185   : > { %v899_v24 = vpop.f32.mrb[3].mxu0  ;;  %917 = vmatmul.mubr.msk.bf16.vlgmr.msra.gmra.mrb[0].mxu1 %vm835_vm3, %v1277_v25 }
 0x258   : > { %v552_v27 = vpop.f32.mrb[0].mxu1 }
 0x259   : > { %v558_v28 = vadd.f32 %v552_v27, %v460_v21  ;;  %v918_v29 = vpop.f32.mrb[1].mxu1 }
 0x25a   : > { %v555_v30 = vpop.f32.mrb[2].mxu1 }
 0x25b   : > { %v565_v31 = vadd.f32 %v837_v26, %v558_v28  ;;  %v919_v32 = vpop.f32.mrb[3].mxu1 }
 0x25d   : > { %1052 = vtanh.f32 %v565_v31 }
 0x262   : > { %571 = sbr.rel (%p838_p4) target bundleno = 833 (0x341), region = 64 }
 0x267   : > { %v1053_v33 = vpop.eup %1052 }
 0x268   : > { %567 = vst [vmem:[#allocation2] sm:$0xff] %v1053_v33  ;;  %v572_v43 = vpack.c.bf16 (!%p838_p4), %v1053_v33, %v1053_v33 }
 0x26a   : > { %937 = vmatmul.mubr.bf16.vlgmr.msra.gmra.mrb[0].mxu0 %v572_v43 }
 0x33d   : > { %v671_v44 = vpop.f32.mrb[0].mxu0 }
 0x33e   : > { %677 = vst [vmem:[#allocation11] sm:$0xff] %v671_v44  ;;  %v938_v45 = vpop.f32.mrb[1].mxu0 }
 0x33f   : > { %v674_v46 = vpop.f32.mrb[2].mxu0 }
 0x340   : > { %v939_v47 = vpop.f32.mrb[3].mxu0 }
 0x341 PF: > { %p975_p7 = scmp.eq.s32.totalorder %s1415_s29, 1  ;;  %s1280_s21 = smov [#allocation11]  }
 0x342   : > { %s687_s13 = sshll.u32 %s1280_s21, 4  ;;  %s688_s13 = int_to_ptr.vmem [resolvable:$true] %s687_s13 }
 0x343   : > { %s1178_s15 = scalar_lea.vmem %s688_s13, 128  ;;  %p1185_p0 = scmp.lt.s32.totalorder %s688_s13, %s688_s13 }
 0x344   : > { %p1179_p9 = scmp.ne.s32.totalorder %s688_s13, %s1178_s15  ;;  %p1186_p8 = scmp.lt.s32.totalorder %s1178_s15, %s1178_s15 }
 0x346   : > { %p1180_p12 = pnand %p1179_p9, %p975_p7  ;;  %p1187_p13 = por %p1186_p8, %p1185_p0 }
 0x348   : > { %p1181_p10 = pneg %p1180_p12 }
 0x34a   : > { %p1188_p2 = pnand %p1187_p13, %p1181_p10 }
 0x34c   : > { %1191 = shalt.err (!%p1188_p2)
}
 0x34d   : > { %s1192_s17 = scalar_lea.hbm %s1625_s5, 128 }
 0x34e   : > { %p1193_p3 = scmp.ne.s32.totalorder %s1625_s5, %s1192_s17  ;;  %p1198_p1 = scmp.lt.u32.totalorder %s1192_s17, %s1625_s5 }
 0x350   : > { %p1194_p5 = pnand %p1193_p3, %p975_p7 }
 0x352   : > { %p1195_p11 = pneg %p1194_p5 }
 0x354   : > { %p1200_p6 = pnand %p1198_p1, %p1195_p11 }
 0x356   : > { %1203 = shalt.err (!%p1200_p6)
}
 0x357   : > { %953 = dma.vmem_to_hbm [thread:$0]  (%p975_p7), %s688_s13, 128, %s1625_s5, [#allocation5]  }
 0x358   : > { %1241 = dma.done.wait (%p975_p7), [#allocation5], 128  }
 0x359   : > { %1243 = vsyncadd (%p975_p7), [#allocation5], 4294967168 }
 0x35a PF: > { %s21_s23 = sadd.s32 1, %s1266_s23   ;;  %s1643_s18 = smov %s1250_s19 }
 0x35b   : > { %p18_p4 = scmp.ge.s32.totalorder %s21_s23, 4   ;;  %s1644_s19 = smov %s1254_s20 }
 0x35c   : > { %s1645_s20 = smov %s1358_s30  ;;  %s1646_s21 = smov %s1262_s22 }
 0x35d   : > { %s1647_s22 = smov %s1649_s24  ;;  %20 = sbr.rel (!%p18_p4) target bundleno = 7 (0x7), region = 110 }
 0x364   :  { %700 = vsyncpa [#allocation4], 1 }
 0x365   :  { %702 = vsyncpa [#allocation4 + $0x1], 1 }
 0x366   :  { %703 = vsyncpa [#allocation7], 1 }
 0x367   :  { %705 = vsyncpa [#allocation7 + $0x1], 1 }
 0x368   :  { %706 = vsyncpa [#allocation10], 1 }
 0x369   :  { %707 = vsyncpa [#allocation5], 1 }
 0x36a   :  { %709 = vsyncpa [#allocation5 + $0x1], 1 }

</bundles_post_ra>
